<compile_context>
chip_gen: v7x
topology: tpu7x:2x2x1
jax: 0.10.0
libtpu: 0.0.40
codegen_flags: <defaults>
</compile_context>

<pallas_src>
import jax
import jax.numpy as jnp
from jax.experimental import pallas as pl
from jax.experimental.pallas import tpu as pltpu


def _round_up(x, m):
    return ((x + m - 1) // m) * m


def _mlp_kernel(x_ref, w1_ref, b1_ref, w2_ref, b2_ref, w3_ref, b3_ref, o_ref):
    # x:  (TM, D) native dtype      w1: (D, 64) bf16   b1: (1, 64) f32
    # w2: (64, 32) bf16             b2: (1, 32) f32
    # w3: (1, 32) f32 (fc3 weight as a row)             b3: (1, 1) f32
    x = x_ref[...].astype(jnp.bfloat16)   # VPU cast, hidden under the tile DMA

    # fc1 + ReLU (MXU, bf16 operands, f32 accumulation)
    h1 = jnp.dot(x, w1_ref[...], preferred_element_type=jnp.float32) + b1_ref[...]
    h1 = jnp.maximum(h1, 0.0)
    # TODO(synk): nn.Dropout(0.5) is identity at inference; intentionally elided.

    # fc2 + ReLU (MXU, bf16 operands, f32 accumulation)
    h2 = jnp.dot(h1.astype(jnp.bfloat16), w2_ref[...],
                 preferred_element_type=jnp.float32) + b2_ref[...]
    h2 = jnp.maximum(h2, 0.0)

    # fc3: (TM,32)@(32,1) would waste an MXU pass -> VPU multiply + XLU lane reduce.
    z = jnp.sum(h2 * w3_ref[...], axis=-1, keepdims=True) + b3_ref[...]

    # Sigmoid on EUP.  Output is a (TM, 1) column (masked stores); tiny relative
    # to x traffic — only worth a lane-dense re-layout if profiles show the
    # store slot binding.
    o_ref[...] = jax.nn.sigmoid(z).astype(o_ref.dtype)


def amujo_ann_inf(x, params, *, block_m=2048):
    """Fused forward pass. x: (B, D). Returns (B, 1) float32."""
    w1, b1, w2, b2, w3, b3 = params
    B, D = x.shape
    H1 = w1.shape[1]   # 64
    H2 = w2.shape[1]   # 32

    # bf16 weights on the MXU path; biases / fc3 stay f32.  x keeps its native
    # dtype so the cast happens on the VPU inside the kernel (no extra HBM pass).
    w1 = w1.astype(jnp.bfloat16)
    w2 = w2.astype(jnp.bfloat16)
    b1 = b1.reshape(1, H1).astype(jnp.float32)
    b2 = b2.reshape(1, H2).astype(jnp.float32)
    w3_row = w3.reshape(1, H2).astype(jnp.float32)
    b3 = b3.reshape(1, 1).astype(jnp.float32)

    itemsize = jnp.dtype(x.dtype).itemsize
    block_m = max(8, (block_m // 8) * 8)
    # Cap the streamed x tile at ~2 MiB so double-buffering stays comfortably
    # inside the default scoped-VMEM budget even for wide inputs.
    cap_rows = max(8, ((2 << 20) // max(1, D * itemsize)) // 8 * 8)
    tm_max = max(8, min(block_m, _round_up(B, 8), cap_rows))
    # Rebalance tile size across grid steps so zero-padding never wastes close
    # to a full tile.
    n_tiles = pl.cdiv(B, tm_max)
    TM = _round_up(pl.cdiv(B, n_tiles), 8)
    n_tiles = pl.cdiv(B, TM)
    B_pad = n_tiles * TM
    if B_pad != B:
        x = jnp.pad(x, ((0, B_pad - B), (0, 0)))  # zero rows; sliced off below

    resident = lambda shape: pl.BlockSpec(shape, lambda i: (0, 0))

    weight_bytes = (D * H1 + H1 * H2) * 2 + (H1 + H2 + H2 + 1) * 4
    out = pl.pallas_call(
        _mlp_kernel,
        out_shape=jax.ShapeDtypeStruct((B_pad, 1), jnp.float32),
        grid=(n_tiles,),
        in_specs=[
            pl.BlockSpec((TM, D), lambda i: (i, 0)),   # x streamed per tile
            resident((D, H1)), resident((1, H1)),      # weights/biases: VMEM-resident
            resident((H1, H2)), resident((1, H2)),
            resident((1, H2)), resident((1, 1)),
        ],
        out_specs=pl.BlockSpec((TM, 1), lambda i: (i, 0)),
        compiler_params=pltpu.CompilerParams(
            dimension_semantics=("parallel",)),        # dual-TC sharding on v7x
        cost_estimate=pl.CostEstimate(
            flops=2 * B_pad * (D * H1 + H1 * H2 + H2),
            transcendentals=B_pad,
            bytes_accessed=B_pad * D * itemsize + B_pad * 4 + weight_bytes,
        ),
    )(x, w1, b1, w2, b2, w3_row, b3)
    return out[:B]


def init_params(key, input_size):
    """Deterministic init mimicking PyTorch Linear defaults:
    U(-1/sqrt(fan_in), 1/sqrt(fan_in)) for both weight and bias.
    Weights stored as (in_features, out_features), f32 (cast to bf16 in wrapper)."""
    def linear(k, fan_in, fan_out):
        kw, kb = jax.random.split(k)
        bound = 1.0 / jnp.sqrt(fan_in)
        w = jax.random.uniform(kw, (fan_in, fan_out), jnp.float32, -bound, bound)
        b = jax.random.uniform(kb, (fan_out,), jnp.float32, -bound, bound)
        return w, b

    k1, k2, k3 = jax.random.split(key, 3)
    w1, b1 = linear(k1, input_size, 64)
    w2, b2 = linear(k2, 64, 32)
    w3, b3 = linear(k3, 32, 1)
    return (w1, b1, w2, b2, w3, b3)


def reference_forward(x, params):
    """Pure-JAX f32 reference matching the PyTorch forward (eval mode)."""
    w1, b1, w2, b2, w3, b3 = params
    h1 = jnp.maximum(x @ w1 + b1, 0.0)
    h2 = jnp.maximum(h1 @ w2 + b2, 0.0)
    return jax.nn.sigmoid(h2 @ w3 + b3)


if __name__ == "__main__":
    key = jax.random.PRNGKey(0)
    k_x, k_p = jax.random.split(key)

    # Small shapes: batch=8, input_size=32.
    B, D = 8, 32
    x = jax.random.normal(k_x, (B, D), jnp.float32)
    params = init_params(k_p, D)

    out = jax.block_until_ready(amujo_ann_inf(x, params))
    ref = reference_forward(x, params)
    assert out.shape == (B, 1)
    # bf16 matmul operands (f32 accumulation) -> relaxed tolerance vs f32 reference.
    assert jnp.allclose(out, ref, atol=2e-2, rtol=2e-2), "mismatch vs reference"

    # Second case exercising padding / non-multiple-of-8 batch.
    B2 = 20
    x2 = jax.random.normal(jax.random.PRNGKey(1), (B2, D), jnp.float32)
    out2 = jax.block_until_ready(amujo_ann_inf(x2, params))
    ref2 = reference_forward(x2, params)
    assert out2.shape == (B2, 1)
    assert jnp.allclose(out2, ref2, atol=2e-2, rtol=2e-2), "mismatch (padded batch)"

    print("KERNEL_OK")
</pallas_src>

<mosaic_0001>
module attributes {stable_mosaic.version = 11 : i64} {
  func.func @_mlp_kernel(%arg0: i32, %arg1: memref<8x32xf32, #tpu.memory_space<vmem>>, %arg2: memref<32x64xbf16, #tpu.memory_space<vmem>>, %arg3: memref<1x64xf32, #tpu.memory_space<vmem>>, %arg4: memref<64x32xbf16, #tpu.memory_space<vmem>>, %arg5: memref<1x32xf32, #tpu.memory_space<vmem>>, %arg6: memref<1x32xf32, #tpu.memory_space<vmem>>, %arg7: memref<1x1xf32, #tpu.memory_space<vmem>>, %arg8: memref<8x1xf32, #tpu.memory_space<vmem>>) attributes {dimension_semantics = [#tpu.dimension_semantics<parallel>], iteration_bounds = array<i64: 1>, scalar_prefetch = 0 : i64, scratch_operands = 0 : i64, tpu.core_type = #tpu.core_type<tc>, window_params = [{transform_indices = @transform_0, window_bounds = array<i64: 8, 32>}, {pipeline_mode = #tpu.pipeline_mode<synchronous>, transform_indices = @transform_1, window_bounds = array<i64: 32, 64>}, {pipeline_mode = #tpu.pipeline_mode<synchronous>, transform_indices = @transform_2, window_bounds = array<i64: 1, 64>}, {pipeline_mode = #tpu.pipeline_mode<synchronous>, transform_indices = @transform_3, window_bounds = array<i64: 64, 32>}, {pipeline_mode = #tpu.pipeline_mode<synchronous>, transform_indices = @transform_4, window_bounds = array<i64: 1, 32>}, {pipeline_mode = #tpu.pipeline_mode<synchronous>, transform_indices = @transform_5, window_bounds = array<i64: 1, 32>}, {pipeline_mode = #tpu.pipeline_mode<synchronous>, transform_indices = @transform_6, window_bounds = array<i64: 1, 1>}, {transform_indices = @transform_7, window_bounds = array<i64: 8, 1>}]} {
    %c0 = arith.constant 0 : index
    %c0_0 = arith.constant 0 : index
    %0 = vector.load %arg1[%c0, %c0_0] : memref<8x32xf32, #tpu.memory_space<vmem>>, vector<8x32xf32>
    %1 = arith.truncf %0 : vector<8x32xf32> to vector<8x32xbf16>
    %c0_1 = arith.constant 0 : index
    %c0_2 = arith.constant 0 : index
    %2 = vector.load %arg2[%c0_1, %c0_2] : memref<32x64xbf16, #tpu.memory_space<vmem>>, vector<32x64xbf16>
    %cst = arith.constant dense<0.000000e+00> : vector<8x64xf32>
    %3 = tpu.matmul %1, %2, %cst {dimension_numbers = #tpu.dot_dimension_numbers<[1], [0], [0], [1], [0, 0, 1, 1], [], []>} : vector<8x32xbf16>, vector<32x64xbf16>, vector<8x64xf32> -> vector<8x64xf32>
    %c0_3 = arith.constant 0 : index
    %c0_4 = arith.constant 0 : index
    %4 = vector.load %arg3[%c0_3, %c0_4] : memref<1x64xf32, #tpu.memory_space<vmem>>, vector<1x64xf32>
    %5 = vector.broadcast %4 : vector<1x64xf32> to vector<8x64xf32>
    %6 = arith.addf %3, %5 : vector<8x64xf32>
    %cst_5 = arith.constant 0.000000e+00 : f32
    %7 = vector.broadcast %cst_5 : f32 to vector<8x64xf32>
    %8 = arith.maximumf %6, %7 : vector<8x64xf32>
    %9 = arith.truncf %8 : vector<8x64xf32> to vector<8x64xbf16>
    %c0_6 = arith.constant 0 : index
    %c0_7 = arith.constant 0 : index
    %10 = vector.load %arg4[%c0_6, %c0_7] : memref<64x32xbf16, #tpu.memory_space<vmem>>, vector<64x32xbf16>
    %cst_8 = arith.constant dense<0.000000e+00> : vector<8x32xf32>
    %11 = tpu.matmul %9, %10, %cst_8 {dimension_numbers = #tpu.dot_dimension_numbers<[1], [0], [0], [1], [0, 0, 1, 1], [], []>} : vector<8x64xbf16>, vector<64x32xbf16>, vector<8x32xf32> -> vector<8x32xf32>
    %c0_9 = arith.constant 0 : index
    %c0_10 = arith.constant 0 : index
    %12 = vector.load %arg5[%c0_9, %c0_10] : memref<1x32xf32, #tpu.memory_space<vmem>>, vector<1x32xf32>
    %13 = vector.broadcast %12 : vector<1x32xf32> to vector<8x32xf32>
    %14 = arith.addf %11, %13 : vector<8x32xf32>
    %cst_11 = arith.constant 0.000000e+00 : f32
    %15 = vector.broadcast %cst_11 : f32 to vector<8x32xf32>
    %16 = arith.maximumf %14, %15 : vector<8x32xf32>
    %c0_12 = arith.constant 0 : index
    %c0_13 = arith.constant 0 : index
    %17 = vector.load %arg6[%c0_12, %c0_13] : memref<1x32xf32, #tpu.memory_space<vmem>>, vector<1x32xf32>
    %18 = vector.broadcast %17 : vector<1x32xf32> to vector<8x32xf32>
    %19 = arith.mulf %16, %18 : vector<8x32xf32>
    %cst_14 = arith.constant dense<0.000000e+00> : vector<8xf32>
    %20 = vector.multi_reduction <add>, %19, %cst_14 [1] : vector<8x32xf32> to vector<8xf32>
    %21 = vector.shape_cast %20 : vector<8xf32> to vector<8x1xf32>
    %c0_15 = arith.constant 0 : index
    %c0_16 = arith.constant 0 : index
    %22 = vector.load %arg7[%c0_15, %c0_16] : memref<1x1xf32, #tpu.memory_space<vmem>>, vector<1x1xf32>
    %23 = vector.broadcast %22 : vector<1x1xf32> to vector<8x1xf32>
    %24 = arith.addf %21, %23 : vector<8x1xf32>
    %25 = arith.negf %24 : vector<8x1xf32>
    %26 = math.exp %25 : vector<8x1xf32>
    %cst_17 = arith.constant 1.000000e+00 : f32
    %27 = vector.broadcast %cst_17 : f32 to vector<8x1xf32>
    %28 = arith.addf %27, %26 : vector<8x1xf32>
    %29 = arith.divf %27, %28 : vector<8x1xf32>
    %c0_18 = arith.constant 0 : index
    %c0_19 = arith.constant 0 : index
    %30 = vector.load %arg8[%c0_18, %c0_19] : memref<8x1xf32, #tpu.memory_space<vmem>>, vector<8x1xf32>
    tpu.vector_store %arg8[%c0_18, %c0_19], %29 {strides = array<i32>} : memref<8x1xf32, #tpu.memory_space<vmem>>, vector<8x1xf32>,
    return
  }
  func.func @transform_0(%arg0: i32) -> (i32, i32) {
    %c0_i32 = arith.constant 0 : i32
    %c0_i32_0 = arith.constant 0 : i32
    return %arg0, %c0_i32 : i32, i32
  }
  func.func @transform_1(%arg0: i32) -> (i32, i32) {
    %c0_i32 = arith.constant 0 : i32
    %c0_i32_0 = arith.constant 0 : i32
    %c0_i32_1 = arith.constant 0 : i32
    return %c0_i32, %c0_i32_0 : i32, i32
  }
  func.func @transform_2(%arg0: i32) -> (i32, i32) {
    %c0_i32 = arith.constant 0 : i32
    %c0_i32_0 = arith.constant 0 : i32
    %c0_i32_1 = arith.constant 0 : i32
    return %c0_i32, %c0_i32_0 : i32, i32
  }
  func.func @transform_3(%arg0: i32) -> (i32, i32) {
    %c0_i32 = arith.constant 0 : i32
    %c0_i32_0 = arith.constant 0 : i32
    %c0_i32_1 = arith.constant 0 : i32
    return %c0_i32, %c0_i32_0 : i32, i32
  }
  func.func @transform_4(%arg0: i32) -> (i32, i32) {
    %c0_i32 = arith.constant 0 : i32
    %c0_i32_0 = arith.constant 0 : i32
    %c0_i32_1 = arith.constant 0 : i32
    return %c0_i32, %c0_i32_0 : i32, i32
  }
  func.func @transform_5(%arg0: i32) -> (i32, i32) {
    %c0_i32 = arith.constant 0 : i32
    %c0_i32_0 = arith.constant 0 : i32
    %c0_i32_1 = arith.constant 0 : i32
    return %c0_i32, %c0_i32_0 : i32, i32
  }
  func.func @transform_6(%arg0: i32) -> (i32, i32) {
    %c0_i32 = arith.constant 0 : i32
    %c0_i32_0 = arith.constant 0 : i32
    %c0_i32_1 = arith.constant 0 : i32
    return %c0_i32, %c0_i32_0 : i32, i32
  }
  func.func @transform_7(%arg0: i32) -> (i32, i32) {
    %c0_i32 = arith.constant 0 : i32
    %c0_i32_0 = arith.constant 0 : i32
    return %arg0, %c0_i32 : i32, i32
  }
}

</mosaic_0001>

<bundles_post_ra>
// kernel: tpu_custom_call.1
= control target key start
LH: loop header
LB: loop body
LE: loop exit
PB: predicated region body
PF: predicated region fallthrough
CT: control target
= control target key end

     0   :  { %v268_v0 = vmov 0.0   ;;  %vm269_vm0 = vmmov 0   ;;  %vm54_vm1 = vcmask 261120   ;;  %vm139_vm2 = vcmask 523264   ;;  %s348_s1 = inlined_call_operand.vmem [shape: bf16[32,64], index: 1, kind: input, shape index: {}]   ;;  %s349_s0 = inlined_call_operand.vmem [shape: f32[8,32], index: 0, kind: input, shape index: {}]   ;;  %s350_s3 = inlined_call_operand.vmem [shape: bf16[64,32], index: 3, kind: input, shape index: {}]   ;;  %s351_s2 = inlined_call_operand.vmem [shape: f32[1,64], index: 2, kind: input, shape index: {}]   ;;  %s352_s6 = inlined_call_operand.<no memory space> [shape: f32[1,1], index: 6, kind: input, shape index: {}]   ;;  %s353_s4 = inlined_call_operand.vmem [shape: f32[1,32], index: 4, kind: input, shape index: {}]   ;;  %s354_s5 = inlined_call_operand.vmem [shape: f32[1,32], index: 5, kind: input, shape index: {}]   ;;  %s355_s7 = inlined_call_operand.vmem [shape: f32[8,1], index: 7, kind: output, shape index: {}]  }
   0x1   :  { %236 = vmatprep.subr.bf16.mxu0 %v268_v0  ;;  %v258_v1 = vld [vmem:[%s348_s1] sm:$0xff]   ;;  %240 = vmatprep.mubr.msk.bf16.mxu0 %vm269_vm0, %v268_v0  ;;  %v259_v2 = vld [vmem:[%s348_s1 + $0x8] sm:$0xff]   ;;  %v262_v7 = vld [vmem:[%s350_s3 + $0x10] sm:$0xff]   ;;  %v12_v17 = vstv %s352_s6  ;;  %vm209_vm3 = vcmask 7168  }
   0x2   :  { %244 = vmatprep.subr.bf16.mxu1 %v268_v0  ;;  %252 = vmatprep.mubr.msk.bf16.mxu1 %vm269_vm0, %v268_v0  ;;  %v29_v3 = vld [vmem:[%s349_s0] sm:$0xff]  ;;  %v261_v5 = vld [vmem:[%s350_s3 + $0x8] sm:$0xff]   ;;  %v263_v8 = vld [vmem:[%s350_s3 + $0x18] sm:$0xff]   ;;  %13 = vst [vmem:[#allocation2] sm:$0x1] %v12_v17 }
   0x3   :  { %237 = vmatpush3.bf16.msra.mxu0 %v258_v1  ;;  %v260_v4 = vld [vmem:[%s350_s3] sm:$0xff]   ;;  %v30_v6 = vpack.c.bf16 %v29_v3, %v29_v3 }
   0x4   :  { %238 = vmatprep.subr.bf16.mxu0 %v268_v0  ;;  %245 = vmatpush3.bf16.msra.mxu1 %v260_v4  ;;  %v215_v9 = vld [vmem:[%s351_s2] ss:$0 sm:$0xff] }
   0x5   :  { %246 = vmatprep.subr.bf16.mxu1 %v268_v0  ;;  %v219_v18 = vld [vmem:[%s353_s4] ss:$0 sm:$0xff] }
   0x6   :  { %v225_v23 = vld [vmem:[%s354_s5] ss:$0 sm:$0xff] }
   0x7   :  { %239 = vmatpush3.bf16.msra.mxu0 %v259_v2 }
   0x8   :  { %247 = vmatpush3.bf16.msra.mxu1 %v261_v5 }
   0x9   :  { %248 = vmatprep.subr.bf16.mxu1 %v268_v0  ;;  %v226_v28 = vld [vmem:[#allocation2] ss:$0 sm:$0xff] }
   0xa   :  { %241 = vmatmul.mubr.msk.bf16.vlgmr.msra.gmra.mrb[0].mxu0 %vm54_vm1, %v30_v6 }
   0xc   :  { %249 = vmatpush3.bf16.msra.mxu1 %v262_v7 }
   0xd   :  { %250 = vmatprep.subr.bf16.mxu1 %v268_v0 }
  0x10   :  { %251 = vmatpush3.bf16.msra.mxu1 %v263_v8 }
  0xdd   :  { %v92_v10 = vpop.f32.mrb[0].mxu0 }
  0xde   :  { %v93_v11 = vadd.f32 %v215_v9, %v92_v10  ;;  %v242_v12 = vpop.f32.mrb[1].mxu0 }
  0xdf   :  { %v95_v13 = vpop.f32.mrb[2].mxu0 }
  0xe0   :  { %v98_v14 = vmax.f32 %v93_v11, 0.0  ;;  %v243_v15 = vpop.f32.mrb[3].mxu0 }
  0xe2   :  { %v99_v16 = vpack.c.bf16 %v98_v14, %v98_v14 }
  0xe4   :  { %253 = vmatmul.mubr.msk.bf16.vlgmr.msra.gmra.mrb[0].mxu1 %vm139_vm2, %v99_v16 }
 0x1b7   :  { %v177_v19 = vpop.f32.mrb[0].mxu1 }
 0x1b8   :  { %v178_v20 = vadd.f32 %v219_v18, %v177_v19  ;;  %v254_v21 = vpop.f32.mrb[1].mxu1 }
 0x1b9   :  { %v180_v22 = vpop.f32.mrb[2].mxu1 }
 0x1ba   :  { %v183_v24 = vmax.f32 %v178_v20, 0.0  ;;  %v255_v25 = vpop.f32.mrb[3].mxu1 }
 0x1bc   :  { %v191_v26 = vmul.f32 %v225_v23, %v183_v24 }
 0x1be   :  { %v192_v27 = vsel %vm54_vm1, %v191_v26, 0.0 }
 0x1bf   :  { %193 = vadd.xlane.f32.xlu0 %v192_v27 }
 0x24c   :  { %v194_v29 = vpop.xlane.xlu0 %193 }
 0x24d   :  { %v202_v30 = vadd.f32 %v226_v28, %v194_v29 }
 0x24f   :  { %v227_v31 = vmul.f32 -1.442695, %v202_v30 }
 0x251   :  { %264 = vpow2.f32 %v227_v31 }
 0x25b   :  { %v265_v32 = vpop.eup %264 }
 0x25c   :  { %v206_v33 = vadd.f32 1.0, %v265_v32 }
 0x25e   :  { %266 = vrcp.f32 %v206_v33 }
 0x268   :  { %v267_v34 = vpop.eup %266 }
 0x269   :  { %210 = vst.msk [vmem:[%s355_s7] sm:$0xff] %vm209_vm3, %v267_v34 }

</bundles_post_ra>
